<compile_context>
chip_gen: v7x
topology: tpu7x:2x2x1
jax: 0.10.0
libtpu: 0.0.40
codegen_flags: <defaults>
</compile_context>

<pallas_src>
import functools

import jax
import jax.numpy as jnp
from jax import lax
from jax.experimental import pallas as pl
from jax.experimental.pallas import tpu as pltpu

_LANES = 128
_TILE_BYTES = 2 * 1024 * 1024   # ~2 MiB per input block per grid step
_CHUNK_ROWS = 256               # inner reduction chunk (bounds live vregs)
_CORE_SPLITS = 2                # leading "parallel" axis -> both v7x TCs


# ----------------------------- Pallas kernel ------------------------------- #

def _dice_kernel(p_ref, t_ref, o_ref, *, total_rows, tile_rows, chunk_rows,
                 steps, mask_tail):
    core = pl.program_id(0)
    step = pl.program_id(1)

    @pl.when(step == 0)
    def _init():
        o_ref[...] = jnp.zeros_like(o_ref)

    # First row (of the whole flattened array) covered by this block.
    base = (core * steps + step) * tile_rows

    def reduce_chunk(start, nrows, carry):
        inter_acc, union_acc = carry
        p = p_ref[pl.ds(start, nrows), :] != 0
        t = t_ref[pl.ds(start, nrows), :] != 0
        if mask_tail:
            row = base + start + lax.broadcasted_iota(
                jnp.int32, (nrows, _LANES), 0)
            valid = row < total_rows
            p = jnp.logical_and(p, valid)
            t = jnp.logical_and(t, valid)
        inter = jnp.sum(jnp.logical_and(p, t).astype(jnp.int32),
                        axis=0, keepdims=True)
        union = jnp.sum(p.astype(jnp.int32) + t.astype(jnp.int32),
                        axis=0, keepdims=True)
        return inter_acc + inter, union_acc + union

    carry = (jnp.zeros((1, _LANES), jnp.int32),
             jnp.zeros((1, _LANES), jnp.int32))

    n_full = tile_rows // chunk_rows
    rem = tile_rows % chunk_rows

    if n_full > 0:
        def body(c, carry):
            start = pl.multiple_of(c * chunk_rows, chunk_rows)
            return reduce_chunk(start, chunk_rows, carry)
        carry = lax.fori_loop(0, n_full, body, carry)
    if rem:
        carry = reduce_chunk(n_full * chunk_rows, rem, carry)

    inter_acc, union_acc = carry
    o_ref[0:1, :] += inter_acc
    o_ref[1:2, :] += union_acc


# ------------------------------ wrapper ------------------------------------ #

def _row_blocks(x):
    """Flatten (native dtype) to lane-dense (rows, 128); tiny tail pad only."""
    flat = x.reshape(-1)
    n = flat.shape[0]
    pad = (-n) % _LANES
    if pad:
        flat = jnp.pad(flat, (0, pad))       # zeros -> False; count-neutral
    return flat.reshape((n + pad) // _LANES, _LANES)


def _pick_tile_rows(rows, itemsize):
    target = max(_CHUNK_ROWS, _TILE_BYTES // (_LANES * itemsize))
    target = (target // _CHUNK_ROWS) * _CHUNK_ROWS   # multiple of 256 (⊇ 8/16/32)
    if rows <= target:
        return rows                                   # single full-array block
    return target


@jax.jit
def dice_counts(y_pred, y_true):
    """Returns int32 [intersection, sum(pred)+sum(true)] of the boolean masks."""
    p = jnp.asarray(y_pred)
    t = jnp.asarray(y_true)
    if p.dtype == jnp.bool_:
        p = p.astype(jnp.uint8)
    if t.dtype == jnp.bool_:
        t = t.astype(jnp.uint8)
    if p.size == 0:
        return jnp.zeros((2,), jnp.int32)

    p2d = _row_blocks(p)
    t2d = _row_blocks(t)
    rows = p2d.shape[0]

    itemsize = max(p2d.dtype.itemsize, t2d.dtype.itemsize)
    tile_rows = _pick_tile_rows(rows, itemsize)
    blocks = pl.cdiv(rows, tile_rows)
    steps = pl.cdiv(blocks, _CORE_SPLITS)
    # Masking is needed whenever the (core, step) grid over-covers the rows.
    mask_tail = (steps * _CORE_SPLITS * tile_rows) != rows

    kernel = functools.partial(
        _dice_kernel,
        total_rows=rows, tile_rows=tile_rows, chunk_rows=_CHUNK_ROWS,
        steps=steps, mask_tail=mask_tail)

    # Clamp the block index so a duplicated tail block never DMAs out of
    # bounds; its rows are masked out in-kernel via `base`, so it adds zero.
    def in_map(c, i):
        return (jnp.minimum(c * steps + i, blocks - 1), 0)

    per_core = pl.pallas_call(
        kernel,
        out_shape=jax.ShapeDtypeStruct((_CORE_SPLITS, 8, _LANES), jnp.int32),
        grid=(_CORE_SPLITS, steps),
        in_specs=[
            pl.BlockSpec((tile_rows, _LANES), in_map),
            pl.BlockSpec((tile_rows, _LANES), in_map),
        ],
        out_specs=pl.BlockSpec((None, 8, _LANES), lambda c, i: (c, 0, 0)),
        compiler_params=pltpu.CompilerParams(
            dimension_semantics=("parallel", "arbitrary")),
    )(p2d, t2d)

    # Tiny fused finish: sum over cores and lanes; rows 2..7 are always zero.
    totals = jnp.sum(per_core, axis=(0, 2))          # (8,) int32
    return totals[:2]                                 # [intersection, im_sum]


class DiceLoss:
    """Pallas-backed equivalent of the reference PyTorch DiceLoss.forward."""

    def __init__(self):
        self.smooth = 1.0  # unused by the reference forward; kept for parity

    def forward(self, y_pred, y_true):
        if jnp.shape(y_pred) != jnp.shape(y_true):
            raise ValueError("Shape mismatch: im1 and im2 must have the same shape.")
        counts = jax.device_get(dice_counts(y_pred, y_true))   # one transfer
        intersection, im_sum = int(counts[0]), int(counts[1])
        if im_sum == 0:
            return 1.0
        # TODO(synk): the data-dependent early return and the (1, value) tuple
        # return are Python control flow from the reference; they stay host-side.
        return (1, -(2.0 * intersection / im_sum))

    __call__ = forward


# ------------------------------ reference ----------------------------------- #

def _counts_ref(y_pred, y_true):
    p = jnp.asarray(y_pred) != 0
    t = jnp.asarray(y_true) != 0
    inter = int(jnp.sum(jnp.logical_and(p, t)))
    im_sum = int(jnp.sum(p)) + int(jnp.sum(t))
    return inter, im_sum


# -------------------------------- main -------------------------------------- #

if __name__ == "__main__":
    key = jax.random.PRNGKey(0)
    k1, k2, k3, k4, k5, k6 = jax.random.split(key, 6)

    # Small segmentation-style masks: batch=2, channels=4, 16x16 spatial.
    shape = (2, 4, 16, 16)
    y_pred = (jax.random.uniform(k1, shape) > 0.5).astype(jnp.float32)
    y_true = (jax.random.uniform(k2, shape) > 0.5).astype(jnp.float32)

    loss = DiceLoss()

    counts = jax.block_until_ready(dice_counts(y_pred, y_true))
    assert tuple(int(c) for c in counts) == _counts_ref(y_pred, y_true), counts

    out = loss.forward(y_pred, y_true)
    inter, im_sum = _counts_ref(y_pred, y_true)
    expected = -(2.0 * inter / im_sum)
    assert isinstance(out, tuple) and out[0] == 1
    assert abs(out[1] - expected) < 1e-6, (out, expected)

    # Empty masks hit the im_sum == 0 branch (returns scalar 1.0).
    zeros = jnp.zeros(shape, jnp.bool_)
    assert loss.forward(zeros, zeros) == 1.0

    # Larger f32 input: rows=10240 -> 3 row-blocks -> 2-core split with a
    # multi-step resident accumulator, clamped duplicate block and tail mask.
    shape2 = (2, 8, 320, 256)
    yp2 = (jax.random.uniform(k3, shape2) > 0.6).astype(jnp.float32)
    yt2 = (jax.random.uniform(k4, shape2) > 0.4).astype(jnp.float32)
    counts2 = jax.block_until_ready(dice_counts(yp2, yt2))
    assert tuple(int(c) for c in counts2) == _counts_ref(yp2, yt2), counts2
    out2 = loss.forward(yp2, yt2)
    assert isinstance(out2, tuple) and out2[0] == 1 and -1.0 <= out2[1] <= 0.0

    # Narrow-dtype (uint8) masks stream at 1 byte/elem (no f32 up-cast).
    shape3 = (2, 4, 96, 96)
    yp3 = (jax.random.uniform(k5, shape3) > 0.7).astype(jnp.uint8)
    yt3 = (jax.random.uniform(k6, shape3) > 0.3).astype(jnp.uint8)
    counts3 = jax.block_until_ready(dice_counts(yp3, yt3))
    assert tuple(int(c) for c in counts3) == _counts_ref(yp3, yt3), counts3

    # Element count not a multiple of 128 exercises the tiny tail pad + mask.
    shape4 = (3, 5, 7)
    yp4 = (jax.random.uniform(k1, shape4) > 0.5).astype(jnp.float32)
    yt4 = (jax.random.uniform(k2, shape4) > 0.5).astype(jnp.float32)
    counts4 = jax.block_until_ready(dice_counts(yp4, yt4))
    assert tuple(int(c) for c in counts4) == _counts_ref(yp4, yt4), counts4

    print("KERNEL_OK")
</pallas_src>

<mosaic_0001>
module attributes {stable_mosaic.version = 11 : i64} {
  func.func @_dice_kernel(%arg0: i32, %arg1: i32, %arg2: memref<16x128xf32, #tpu.memory_space<vmem>>, %arg3: memref<16x128xf32, #tpu.memory_space<vmem>>, %arg4: memref<1x8x128xi32, #tpu.memory_space<vmem>>) attributes {dimension_semantics = [#tpu.dimension_semantics<parallel>, #tpu.dimension_semantics<arbitrary>], iteration_bounds = array<i64: 2, 1>, scalar_prefetch = 0 : i64, scratch_operands = 0 : i64, tpu.core_type = #tpu.core_type<tc>, window_params = [{transform_indices = @transform_0, window_bounds = array<i64: 16, 128>}, {transform_indices = @transform_1, window_bounds = array<i64: 16, 128>}, {transform_indices = @transform_2, window_bounds = array<i64: 1, 8, 128>}]} {
    %c0_i32 = arith.constant 0 : i32
    %0 = arith.cmpi eq, %arg1, %c0_i32 : i32
    %1 = arith.extui %0 : i1 to i32
    %c0_i32_0 = arith.constant 0 : i32
    %2 = arith.cmpi ne, %1, %c0_i32_0 : i32
    scf.if %2 {
      %c0_i32_22 = arith.constant 0 : i32
      %45 = vector.broadcast %c0_i32_22 : i32 to vector<8x128xi32>
      %c0_23 = arith.constant 0 : index
      %c0_24 = arith.constant 0 : index
      %c0_25 = arith.constant 0 : index
      %46 = vector.load %arg4[%c0_23, %c0_24, %c0_25] : memref<1x8x128xi32, #tpu.memory_space<vmem>>, vector<1x8x128xi32>
      %47 = vector.shape_cast %46 : vector<1x8x128xi32> to vector<8x128xi32>
      %48 = vector.shape_cast %45 : vector<8x128xi32> to vector<1x8x128xi32>
      tpu.vector_store %arg4[%c0_23, %c0_24, %c0_25], %48 {strides = array<i32>} : memref<1x8x128xi32, #tpu.memory_space<vmem>>, vector<1x8x128xi32>,
    } else {
    }
    %c1_i32 = arith.constant 1 : i32
    %3 = arith.muli %arg0, %c1_i32 : i32
    %4 = arith.addi %3, %arg1 : i32
    %c16_i32 = arith.constant 16 : i32
    %5 = arith.muli %4, %c16_i32 : i32
    %c0_i32_1 = arith.constant 0 : i32
    %6 = vector.broadcast %c0_i32_1 : i32 to vector<1x128xi32>
    %c0_i32_2 = arith.constant 0 : i32
    %7 = vector.broadcast %c0_i32_2 : i32 to vector<1x128xi32>
    %c0 = arith.constant 0 : index
    %c0_3 = arith.constant 0 : index
    %8 = vector.load %arg2[%c0, %c0_3] : memref<16x128xf32, #tpu.memory_space<vmem>>, vector<16x128xf32>
    %cst = arith.constant 0.000000e+00 : f32
    %9 = vector.broadcast %cst : f32 to vector<16x128xf32>
    %10 = arith.cmpf one, %8, %9 : vector<16x128xf32>
    %c0_4 = arith.constant 0 : index
    %c0_5 = arith.constant 0 : index
    %11 = vector.load %arg3[%c0_4, %c0_5] : memref<16x128xf32, #tpu.memory_space<vmem>>, vector<16x128xf32>
    %cst_6 = arith.constant 0.000000e+00 : f32
    %12 = vector.broadcast %cst_6 : f32 to vector<16x128xf32>
    %13 = arith.cmpf one, %11, %12 : vector<16x128xf32>
    %c0_i32_7 = arith.constant 0 : i32
    %14 = arith.addi %5, %c0_i32_7 : i32
    %15 = tpu.iota {dimensions = array<i32: 0>} : vector<16x128xi32>
    %16 = vector.broadcast %14 : i32 to vector<16x128xi32>
    %17 = arith.addi %16, %15 : vector<16x128xi32>
    %c16_i32_8 = arith.constant 16 : i32
    %18 = vector.broadcast %c16_i32_8 : i32 to vector<16x128xi32>
    %19 = arith.cmpi slt, %17, %18 : vector<16x128xi32>
    %20 = arith.andi %10, %19 : vector<16x128xi1>
    %21 = arith.andi %13, %19 : vector<16x128xi1>
    %22 = arith.andi %20, %21 : vector<16x128xi1>
    %23 = arith.extui %22 : vector<16x128xi1> to vector<16x128xi32>
    %cst_9 = arith.constant dense<0> : vector<128xi32>
    %24 = vector.multi_reduction <add>, %23, %cst_9 [0] : vector<16x128xi32> to vector<128xi32>
    %25 = vector.shape_cast %24 : vector<128xi32> to vector<1x128xi32>
    %26 = arith.extui %20 : vector<16x128xi1> to vector<16x128xi32>
    %27 = arith.extui %21 : vector<16x128xi1> to vector<16x128xi32>
    %28 = arith.addi %26, %27 : vector<16x128xi32>
    %cst_10 = arith.constant dense<0> : vector<128xi32>
    %29 = vector.multi_reduction <add>, %28, %cst_10 [0] : vector<16x128xi32> to vector<128xi32>
    %30 = vector.shape_cast %29 : vector<128xi32> to vector<1x128xi32>
    %31 = arith.addi %6, %25 : vector<1x128xi32>
    %32 = arith.addi %7, %30 : vector<1x128xi32>
    %c0_11 = arith.constant 0 : index
    %c0_12 = arith.constant 0 : index
    %c0_13 = arith.constant 0 : index
    %33 = vector.load %arg4[%c0_11, %c0_12, %c0_13] : memref<1x8x128xi32, #tpu.memory_space<vmem>>, vector<1x1x128xi32>
    %34 = vector.shape_cast %33 : vector<1x1x128xi32> to vector<1x128xi32>
    %35 = arith.addi %34, %31 : vector<1x128xi32>
    %c0_14 = arith.constant 0 : index
    %c0_15 = arith.constant 0 : index
    %c0_16 = arith.constant 0 : index
    %36 = vector.load %arg4[%c0_14, %c0_15, %c0_16] : memref<1x8x128xi32, #tpu.memory_space<vmem>>, vector<1x1x128xi32>
    %37 = vector.shape_cast %36 : vector<1x1x128xi32> to vector<1x128xi32>
    %38 = vector.shape_cast %35 : vector<1x128xi32> to vector<1x1x128xi32>
    tpu.vector_store %arg4[%c0_14, %c0_15, %c0_16], %38 {strides = array<i32>} : memref<1x8x128xi32, #tpu.memory_space<vmem>>, vector<1x1x128xi32>,
    %c0_17 = arith.constant 0 : index
    %c1 = arith.constant 1 : index
    %c0_18 = arith.constant 0 : index
    %39 = vector.load %arg4[%c0_17, %c1, %c0_18] : memref<1x8x128xi32, #tpu.memory_space<vmem>>, vector<1x1x128xi32>
    %40 = vector.shape_cast %39 : vector<1x1x128xi32> to vector<1x128xi32>
    %41 = arith.addi %40, %32 : vector<1x128xi32>
    %c0_19 = arith.constant 0 : index
    %c1_20 = arith.constant 1 : index
    %c0_21 = arith.constant 0 : index
    %42 = vector.load %arg4[%c0_19, %c1_20, %c0_21] : memref<1x8x128xi32, #tpu.memory_space<vmem>>, vector<1x1x128xi32>
    %43 = vector.shape_cast %42 : vector<1x1x128xi32> to vector<1x128xi32>
    %44 = vector.shape_cast %41 : vector<1x128xi32> to vector<1x1x128xi32>
    tpu.vector_store %arg4[%c0_19, %c1_20, %c0_21], %44 {strides = array<i32>} : memref<1x8x128xi32, #tpu.memory_space<vmem>>, vector<1x1x128xi32>,
    return
  }
  func.func @transform_0(%arg0: i32, %arg1: i32) -> (i32, i32) {
    %c1_i32 = arith.constant 1 : i32
    %0 = arith.muli %arg0, %c1_i32 : i32
    %1 = arith.addi %0, %arg1 : i32
    %c0_i32 = arith.constant 0 : i32
    %2 = arith.minsi %1, %c0_i32 : i32
    %c0_i32_0 = arith.constant 0 : i32
    %c0_i32_1 = arith.constant 0 : i32
    return %2, %c0_i32_0 : i32, i32
  }
  func.func @transform_1(%arg0: i32, %arg1: i32) -> (i32, i32) {
    %c1_i32 = arith.constant 1 : i32
    %0 = arith.muli %arg0, %c1_i32 : i32
    %1 = arith.addi %0, %arg1 : i32
    %c0_i32 = arith.constant 0 : i32
    %2 = arith.minsi %1, %c0_i32 : i32
    %c0_i32_0 = arith.constant 0 : i32
    %c0_i32_1 = arith.constant 0 : i32
    return %2, %c0_i32_0 : i32, i32
  }
  func.func @transform_2(%arg0: i32, %arg1: i32) -> (i32, i32, i32) {
    %c0_i32 = arith.constant 0 : i32
    %c0_i32_0 = arith.constant 0 : i32
    %c0_i32_1 = arith.constant 0 : i32
    return %arg0, %c0_i32, %c0_i32_0 : i32, i32, i32
  }
}

</mosaic_0001>

<bundles_post_ra>
// kernel: dice_counts.1
= control target key start
LH: loop header
LB: loop body
LE: loop exit
PB: predicated region body
PF: predicated region fallthrough
CT: control target
= control target key end

     0   :  { %s428_s9 = smov 0   ;;  %s430_s10 = smov 0   ;;  %s471_s0 = inlined_call_operand.vmem [shape: f32[16,128], index: 0, kind: input, shape index: {}]   ;;  %s472_s1 = inlined_call_operand.vmem [shape: f32[16,128], index: 1, kind: input, shape index: {}]   ;;  %s473_s2 = inlined_call_operand.vmem [shape: s32[2,8,128], index: 2, kind: output, shape index: {}]  }
   0x1   :  { %s432_s11 = smov 0  }
   0x2 LB: > { %s24_s12 = sadd.s32 1, %s406_s10  ;;  %p354_p0 = scmp.ge.s32.totalorder %s410_s11, 1  ;;  %s410_s11 = sphi %s432_s11, %s12_s11   ;;  %s406_s10 = sphi %s430_s10, %s475_s10   ;;  %s402_s9 = sphi %s428_s9, %s474_s9  }
   0x3   : > { %p26_p1 = scmp.ge.s32.totalorder %s24_s12, 2  ;;  %p160_p2 = scmp.lt.s32.totalorder %s410_s11, 3 }
   0x5   : > { %s477_s12 = smov (%p26_p1, %s24_s12), 0  ;;  %p161_p3 = pnand %p354_p0, %p160_p2 }
   0x6   : > { %p216_p4 = scmp.lt.s32.totalorder (!%p161_p3), %s402_s9, 1  ;;  %p193_p5 = scmp.lt.s32.totalorder (!%p161_p3), %s402_s9, 0  ;;  %v235_v0 = vlaneseq (!%p161_p3)  ;;  %v412_v4 = vmov (!%p161_p3), 0  }
   0x7   : > { %164 = sbr.rel (%p161_p3) target bundleno = 48 (0x30), region = 28  ;;  %s360_s13 = sshll.u32 (!%p161_p3), %s402_s9, 4 }
   0x8   : > { %v236_v1 = vshrl.u32 (!%p161_p3), %v235_v0, 7  ;;  %v238_v3 = vstv (!%p161_p3), %s360_s13 }
   0xa   : > { %v237_v2 = vadd.s32 (!%p161_p3), 8, %v236_v1  ;;  %v239_v5 = vadd.s32 (!%p161_p3), %v238_v3, %v236_v1 }
   0xc   : > { %v240_v6 = vadd.s32 (!%p161_p3), %v238_v3, %v237_v2  ;;  %vm241_vm0 = vcmp.lt.s32.totalorder (!%p161_p3), %v239_v5, 16 }
   0xe   : > { %s217_s14 = scalar_select %p216_p4, %s402_s9, 1  ;;  %vm242_vm1 = vcmp.lt.s32.totalorder %v240_v6, 16 }
   0xf   : > { %s479_s9 = smov (!%p193_p5, %s402_s9), 0 }
  0x10   : > { %s359_s15 = sshll.u32 %s217_s14, 3  ;;  %s355_s19 = sshll.u32 %s479_s9, 1 }
  0x11   : > { %s449_s18 = scalar_lea.vmem %s473_s2, %s359_s15  ;;  %p196_p6 = scmp.lt.s32.totalorder %s355_s19, 1 }
  0x12   : > { %224 = vst [vmem:[%s449_s18] sm:$0xff] %v412_v4 }
  0x13   : > { %s481_s19 = smov (!%p196_p6, %s355_s19), 1 }
  0x14   : > { %s356_s20 = sshll.u32 %s481_s19, 3 }
  0x15   : > { %s199_s23 = scalar_lea.vmem %s471_s0, %s356_s20  ;;  %s211_s26 = scalar_lea.vmem %s472_s1, %s356_s20 }
  0x16   : > { %v227_v7 = vld [vmem:[%s199_s23] sm:$0xff]  ;;  %v228_v8 = vld [vmem:[%s199_s23 + $0x8] sm:$0xff] }
  0x17   : > { %v231_v9 = vld [vmem:[%s211_s26] sm:$0xff]  ;;  %vm229_vm2 = vcmp.ne.f32.partialorder %v227_v7, 0.0  ;;  %vm230_vm3 = vcmp.ne.f32.partialorder %v228_v8, 0.0  ;;  %v232_v10 = vld [vmem:[%s211_s26 + $0x8] sm:$0xff] }
  0x18   : > { %vm233_vm4 = vcmp.ne.f32.partialorder %v231_v9, 0.0  ;;  %vm234_vm5 = vcmp.ne.f32.partialorder %v232_v10, 0.0  ;;  %vm243_vm6 = vmand %vm229_vm2, %vm241_vm0 }
  0x19   : > { %vm244_vm7 = vmand %vm230_vm3, %vm242_vm1  ;;  %v258_v11 = vsel %vm243_vm6, 1, %v412_v4  ;;  %v271_v31 = vld [vmem:[%s449_s18] sm:$0x1]  ;;  %v274_v32 = vld [vmem:[%s449_s18 + $0x1] sm:$0x1] }
  0x1a   : > { %vm245_vm8 = vmand %vm233_vm4, %vm241_vm0  ;;  %v259_v12 = vsel %vm244_vm7, 1, %v412_v4 }
  0x1b   : > { %vm246_vm9 = vmand %vm234_vm5, %vm242_vm1  ;;  %v260_v13 = vsel %vm245_vm8, 1, %v412_v4 }
  0x1c   : > { %vm247_vm10 = vmand %vm243_vm6, %vm245_vm8  ;;  %v261_v14 = vsel %vm246_vm9, 1, %v412_v4  ;;  %v262_v15 = vadd.s32 %v260_v13, %v258_v11 }
  0x1d   : > { %vm248_vm11 = vmand %vm244_vm7, %vm246_vm9  ;;  %v249_v16 = vsel %vm247_vm10, 1, %v412_v4  ;;  %v263_v17 = vadd.s32 %v261_v14, %v259_v12 }
  0x1e   : > { %v250_v18 = vsel %vm248_vm11, 1, %v412_v4 }
  0x1f   : > { %v251_v19 = vadd.s32 %v250_v18, %v249_v16  ;;  %v264_v20 = vadd.s32 %v263_v17, %v262_v15 }
  0x21   : > { %v252_v21 = vrot.slane %v251_v19, 4  ;;  %v265_v22 = vrot.slane %v264_v20, 4 }
  0x23   : > { %v253_v23 = vadd.s32 %v252_v21, %v251_v19  ;;  %v266_v24 = vadd.s32 %v265_v22, %v264_v20 }
  0x25   : > { %v254_v25 = vrot.slane %v253_v23, 2  ;;  %v267_v26 = vrot.slane %v266_v24, 2 }
  0x27   : > { %v255_v27 = vadd.s32 %v254_v25, %v253_v23  ;;  %v268_v28 = vadd.s32 %v267_v26, %v266_v24 }
  0x29   : > { %v256_v29 = vrot.slane %v255_v27, 1  ;;  %v269_v30 = vrot.slane %v268_v28, 1 }
  0x2b   : > { %v257_v33 = vadd.s32 %v256_v29, %v255_v27  ;;  %v270_v34 = vadd.s32 %v269_v30, %v268_v28 }
  0x2d   : > { %v272_v35 = vadd.s32 %v271_v31, %v257_v33  ;;  %v275_v36 = vadd.s32 %v274_v32, %v270_v34 }
  0x2f   : > { %273 = vst [vmem:[%s449_s18] sm:$0x1] %v272_v35  ;;  %276 = vst [vmem:[%s449_s18 + $0x1] sm:$0x1] %v275_v36 }
  0x30 PF: > { %s12_s11 = sadd.s32 1, %s410_s11   ;;  %s474_s9 = smov %s406_s10 }
  0x31   : > { %p9_p7 = scmp.ge.s32.totalorder %s12_s11, 4   ;;  %s475_s10 = smov %s477_s12 }
  0x33   :  { %11 = sbr.rel (!%p9_p7) target bundleno = 2 (0x2), region = 65 }

</bundles_post_ra>
